<compile_context>
chip_gen: v6e
topology: v6e:2x2x1
jax: 0.10.0
libtpu: 0.0.40
codegen_flags: <defaults>
</compile_context>

<pallas_src>
import functools

import jax
import jax.numpy as jnp
from jax import lax
from jax.experimental import pallas as pl
from jax.experimental.pallas import tpu as pltpu


def _round_up(x, m):
    return (x + m - 1) // m * m


def _cdiv(a, b):
    return (a + b - 1) // b


def _vmem_limit_bytes(block_bytes, scratch_bytes=0):
    """Scoped-VMEM budget: double-buffered pipeline blocks + resident scratch,
    2x headroom, clamped to [32 MiB, 64 MiB] (64 MiB = v7x physical VMEM)."""
    need = 2 * block_bytes + scratch_bytes
    return int(min(max(2 * need + (4 << 20), 32 << 20), 64 << 20))


def _qkv_proj_kernel(x_ref, w_ref, q_ref, k_ref, v_ref, *, fused_width):
    """Fused (scaled-Q | K | V) projection for one (batch, row-tile) step.

    x_ref : (1, tp, C)        bf16 input rows
    w_ref : (C, 3*H*Cph)      bf16 fused weight (softmax scale folded into Q,
                              per-head column blocks zero-padded to Cph lanes)
    q/k/v : (1, tp, H*Cph)    bf16 outputs
    """
    x = x_ref[0]                                                    # (tp, C)
    qkv = jnp.dot(x, w_ref[...], preferred_element_type=jnp.float32)
    qkv = qkv.astype(jnp.bfloat16)                                  # (tp, 3*HCp)
    w = fused_width
    q_ref[0] = qkv[:, :w]
    k_ref[0] = qkv[:, w:2 * w]
    v_ref[0] = qkv[:, 2 * w:]


def _flash_attn_kernel(q_ref, k_ref, v_ref, wp_ref, bp_ref, out_ref,
                       m_sc, l_sc, acc_sc, *, num_heads, head_pad, seq_len,
                       kv_tile, masked):
    """One (batch, q_tile, kv_tile) grid step of flash-style attention.

    q_ref  : (1, tq, H*Cph)  bf16, softmax scale already folded in
    k_ref  : (1, tk, H*Cph)  bf16
    v_ref  : (1, tk, H*Cph)  bf16
    wp_ref : (H*Cph, Cp)     bf16 fused output projection (zero rows at pads)
    bp_ref : (1, Cp)         f32 output bias (lane-padded)
    out_ref: (1, tq, Cp)
    m_sc   : (H, tq, 1) f32 running max
    l_sc   : (H, tq, 1) f32 running softmax denominator
    acc_sc : (tq, H*Cph) f32 running (softmax @ V) accumulator
    """
    H, Cph = num_heads, head_pad
    ki = pl.program_id(2)

    @pl.when(ki == 0)
    def _init():
        m_sc[...] = jnp.full_like(m_sc, -jnp.inf)
        l_sc[...] = jnp.zeros_like(l_sc)
        acc_sc[...] = jnp.zeros_like(acc_sc)

    q = q_ref[0]                                                    # (tq, HCp)
    k = k_ref[0]                                                    # (tk, HCp)
    v = v_ref[0]                                                    # (tk, HCp)

    if masked:  # trace-time flag: only present when the sequence was padded;
        # only the last kv tile can contain padded columns (interior tiles get
        # an all-zero bias -> a single cheap broadcast add per head).
        col = ki * kv_tile + lax.broadcasted_iota(jnp.int32, (1, kv_tile), 1)
        bias = jnp.where(col < seq_len, 0.0, -1e30).astype(jnp.float32)

    # TODO(synk): switch this static unroll to lax.fori_loop(unroll=True) once
    # num_heads grows beyond ~4 (bounds live ranges / vreg pressure).
    for h in range(H):
        sl = slice(h * Cph, (h + 1) * Cph)          # lane-aligned (Cph % 128 == 0)
        q_h = q[:, sl]
        k_h = k[:, sl]
        v_h = v[:, sl]

        # scores: contract last dims directly (no k.T relayout); scale is folded.
        s = lax.dot_general(q_h, k_h, (((1,), (1,)), ((), ())),
                            preferred_element_type=jnp.float32)    # (tq, tk) f32
        if masked:
            s = s + bias

        m_prev = m_sc[h]                                            # (tq, 1)
        m_new = jnp.maximum(m_prev, jnp.max(s, axis=-1, keepdims=True))
        alpha = jnp.exp(m_prev - m_new)
        p = jnp.exp(s - m_new)                                      # (tq, tk) f32
        l_sc[h] = alpha * l_sc[h] + jnp.sum(p, axis=-1, keepdims=True)
        acc_sc[:, sl] = alpha * acc_sc[:, sl] + jnp.dot(
            p.astype(jnp.bfloat16), v_h, preferred_element_type=jnp.float32)
        m_sc[h] = m_new

    @pl.when(ki == pl.num_programs(2) - 1)
    def _finalize():
        # per-head normalization, then ONE fused output projection matmul
        for h in range(H):
            sl = slice(h * Cph, (h + 1) * Cph)
            acc_sc[:, sl] = acc_sc[:, sl] * pl.reciprocal(l_sc[h], approx=True)
        y = jnp.dot(acc_sc[...].astype(jnp.bfloat16), wp_ref[...],
                    preferred_element_type=jnp.float32)
        out_ref[0] = (y + bp_ref[...]).astype(out_ref.dtype)


class SelfAttentionPallas:
    """JAX/Pallas port of the PyTorch SelfAttention module (forward only)."""

    def __init__(self, dim, num_heads=1, qkv_bias=False, key=None):
        assert dim % num_heads == 0, 'dim should be divisible by num_heads'
        # TODO(synk): qkv_bias=True path not implemented (module default is False).
        assert not qkv_bias
        self.dim = dim
        self.num_heads = num_heads
        head_dim = dim // num_heads
        self.scale = head_dim ** (-0.5)

        if key is None:
            key = jax.random.PRNGKey(0)
        k1, k2, k3 = jax.random.split(key, 3)
        C, H = dim, num_heads

        # master parameters (nn.Linear conventions, f32)
        lim_qkv = 1.0 / (C ** 0.5)
        self.w_qkv = jax.random.uniform(k1, (3 * H * C, C), jnp.float32,
                                        -lim_qkv, lim_qkv)
        lim_p = 1.0 / ((C * H) ** 0.5)
        self.w_proj = jax.random.uniform(k2, (C, H * C), jnp.float32, -lim_p, lim_p)
        self.b_proj = jax.random.uniform(k3, (C,), jnp.float32, -lim_p, lim_p)

        # --- kernel-ready layouts, prepared ONCE (hoisted out of __call__) ---
        self._cph = _round_up(C, 128)     # per-head width, lane-padded
        self._c_pad = _round_up(C, 128)   # output channel dim, lane-padded
        Cph, Cp = self._cph, self._c_pad

        # fused (scaled-Q | K | V) weight with per-head lane padding:
        #   column layout = [s][h][padded c], each head block 128-aligned.
        wt = self.w_qkv.T.reshape(C, 3, H, C)                       # (C, 3, H, C)
        w_all = jnp.zeros((C, 3, H, Cph), jnp.float32)
        w_all = w_all.at[..., :C].set(wt)
        w_all = w_all.at[:, 0].multiply(self.scale)                 # fold scale into Q
        self._w_qkv_fused = w_all.reshape(C, 3 * H * Cph).astype(jnp.bfloat16)

        # fused output projection (H*Cph, Cp): zero rows at head padding,
        # zero cols at output lane padding.
        wp = self.w_proj.T.reshape(H, C, C)                         # (H, C_head, C_out)
        wp_pad = jnp.zeros((H, Cph, Cp), jnp.float32)
        wp_pad = wp_pad.at[:, :C, :C].set(wp)
        self._wp_fused = wp_pad.reshape(H * Cph, Cp).astype(jnp.bfloat16)

        bp = jnp.zeros((1, Cp), jnp.float32)
        self._bp = bp.at[0, :C].set(self.b_proj)

    def __call__(self, x, mask=None, pool=1):
        B, N, C = x.shape
        assert C == self.dim
        H = self.num_heads
        Cph, Cp = self._cph, self._c_pad
        HCp = H * Cph

        # --- decoupled q / kv tiles (tq amortizes weights + step overhead) ---
        if N <= 512:
            tq = _round_up(N, 8)
            tk = tq
        else:
            tq, tk = 512, 256                 # tq % tk == 0
        n_pad = _round_up(N, tq)
        n_q_tiles = n_pad // tq
        n_kv_tiles = _cdiv(N, tk)             # fully-padded kv tiles are skipped
        masked = (n_kv_tiles * tk != N)
        # prologue row tile (must divide n_pad)
        tp = 256 if (tq > 256 and tq % 256 == 0) else tq

        # bf16 pre-cast + sequence pad in the wrapper (no in-kernel converts)
        xp = x.astype(jnp.bfloat16)
        if n_pad != N:
            xp = jnp.pad(xp, ((0, 0), (0, n_pad - N), (0, 0)))

        out_itemsize = jnp.dtype(x.dtype).itemsize

        # ---------------- prologue: fused scaled-Q | K | V projection --------
        # TODO(synk): for very large H*C the fused output lane dim should get
        # its own grid axis; not needed at these sizes.
        proj_block_bytes = (tp * C * 2 + C * 3 * HCp * 2 + 3 * tp * HCp * 2)
        q_all, k_all, v_all = pl.pallas_call(
            functools.partial(_qkv_proj_kernel, fused_width=HCp),
            out_shape=(jax.ShapeDtypeStruct((B, n_pad, HCp), jnp.bfloat16),
                       jax.ShapeDtypeStruct((B, n_pad, HCp), jnp.bfloat16),
                       jax.ShapeDtypeStruct((B, n_pad, HCp), jnp.bfloat16)),
            grid_spec=pltpu.PrefetchScalarGridSpec(
                num_scalar_prefetch=0,
                grid=(B, n_pad // tp),
                in_specs=[
                    pl.BlockSpec((1, tp, C), lambda b, i: (b, i, 0)),       # x rows
                    pl.BlockSpec((C, 3 * HCp), lambda b, i: (0, 0)),        # fused W
                ],
                out_specs=(
                    pl.BlockSpec((1, tp, HCp), lambda b, i: (b, i, 0)),
                    pl.BlockSpec((1, tp, HCp), lambda b, i: (b, i, 0)),
                    pl.BlockSpec((1, tp, HCp), lambda b, i: (b, i, 0)),
                ),
            ),
            compiler_params=pltpu.CompilerParams(
                dimension_semantics=("parallel", "parallel"),
                vmem_limit_bytes=_vmem_limit_bytes(proj_block_bytes)),
        )(xp, self._w_qkv_fused)

        # ---------------- flash attention + fused output projection ----------
        # (v7x note: B * n_q_tiles should be >= 2 so both TensorCores get work.)
        flash_block_bytes = (tq * HCp * 2 + 2 * tk * HCp * 2 + HCp * Cp * 2
                             + Cp * 4 + tq * Cp * out_itemsize)
        flash_scratch_bytes = tq * HCp * 4 + 2 * H * tq * 4
        kernel = functools.partial(
            _flash_attn_kernel, num_heads=H, head_pad=Cph, seq_len=N,
            kv_tile=tk, masked=masked)

        out = pl.pallas_call(
            kernel,
            # TODO(synk): output could be written bf16 (half the HBM writeback)
            # if the consumer tolerates it; kept at x.dtype for fidelity.
            out_shape=jax.ShapeDtypeStruct((B, n_pad, Cp), x.dtype),
            grid_spec=pltpu.PrefetchScalarGridSpec(
                num_scalar_prefetch=0,
                grid=(B, n_q_tiles, n_kv_tiles),
                in_specs=[
                    pl.BlockSpec((1, tq, HCp), lambda b, qi, ki: (b, qi, 0)),  # Q
                    pl.BlockSpec((1, tk, HCp), lambda b, qi, ki: (b, ki, 0)),  # K
                    pl.BlockSpec((1, tk, HCp), lambda b, qi, ki: (b, ki, 0)),  # V
                    pl.BlockSpec((HCp, Cp), lambda b, qi, ki: (0, 0)),         # Wp fused
                    pl.BlockSpec((1, Cp), lambda b, qi, ki: (0, 0)),           # bias
                ],
                out_specs=pl.BlockSpec((1, tq, Cp), lambda b, qi, ki: (b, qi, 0)),
                scratch_shapes=[
                    pltpu.VMEM((H, tq, 1), jnp.float32),     # running max
                    pltpu.VMEM((H, tq, 1), jnp.float32),     # running denominator
                    pltpu.VMEM((tq, HCp), jnp.float32),      # fused PV accumulator
                ],
            ),
            compiler_params=pltpu.CompilerParams(
                dimension_semantics=("parallel", "parallel", "arbitrary"),
                vmem_limit_bytes=_vmem_limit_bytes(flash_block_bytes,
                                                   flash_scratch_bytes)),
        )(q_all, k_all, v_all, self._wp_fused, self._bp)

        out = out[:, :N, :C]   # strip sequence + lane padding

        attn_mask = None
        if mask is not None:
            m = mask
            if pool > 1:
                mod = m.shape[-1] % pool
                if mod > 0:
                    m = jnp.pad(m, ((0, 0), (0, int(pool - mod))),
                                constant_values=True)
                m = jnp.max(m.reshape(m.shape[0], -1, pool), axis=-1)
            # final returned mask: repeat(mask, 'b n -> b n a', a=dim)
            attn_mask = jnp.broadcast_to(m[:, :, None], (B, m.shape[1], C))
        return out, attn_mask


def _ref_forward(x, w_qkv, w_proj, b_proj, num_heads, scale):
    """Pure-JAX f32 reference mirroring the PyTorch forward (mask unused for x)."""
    B, N, C = x.shape
    qkv = (x @ w_qkv.T).reshape(B, N, 3, num_heads, C).transpose(2, 0, 3, 1, 4)
    q, k, v = qkv[0], qkv[1], qkv[2]
    attn = (q @ jnp.swapaxes(k, -2, -1)) * scale
    attn = jax.nn.softmax(attn, axis=-1)
    out = jnp.swapaxes(attn @ v, 1, 2).reshape(B, N, -1)
    return out @ w_proj.T + b_proj


if __name__ == "__main__":
    B, N, dim, num_heads = 2, 8, 32, 2

    key = jax.random.PRNGKey(0)
    k_x, k_params = jax.random.split(key)
    x = jax.random.normal(k_x, (B, N, dim), jnp.float32)

    module = SelfAttentionPallas(dim, num_heads=num_heads, qkv_bias=False,
                                 key=k_params)

    # small, single-tile path
    out, attn_mask = module(x, mask=None, pool=1)
    out = jax.block_until_ready(out)
    ref = _ref_forward(x, module.w_qkv, module.w_proj, module.b_proj,
                       num_heads, module.scale)
    assert out.shape == (B, N, dim)
    assert jnp.allclose(out, ref, atol=5e-2, rtol=5e-2), \
        f"mismatch vs reference: max abs diff {jnp.max(jnp.abs(out - ref))}"

    # larger sequence: exercises the prologue projection + online softmax path
    N2 = 320
    x2 = jax.random.normal(jax.random.PRNGKey(2), (B, N2, dim), jnp.float32)
    out2, _ = module(x2, mask=None, pool=1)
    out2 = jax.block_until_ready(out2)
    ref2 = _ref_forward(x2, module.w_qkv, module.w_proj, module.b_proj,
                        num_heads, module.scale)
    assert out2.shape == (B, N2, dim)
    assert jnp.allclose(out2, ref2, atol=5e-2, rtol=5e-2), \
        f"mismatch vs reference (tiled): max abs diff {jnp.max(jnp.abs(out2 - ref2))}"

    # mask-return glue path (mask never affects x in the reference module)
    mask = jax.random.bernoulli(jax.random.PRNGKey(1), 0.5, (B, N))
    out_m, attn_mask_m = module(x, mask=mask, pool=1)
    jax.block_until_ready(out_m)
    assert attn_mask_m.shape == (B, N, dim)

    print("KERNEL_OK")
</pallas_src>

<mosaic_0001>
module attributes {stable_mosaic.version = 11 : i64} {
  func.func @_qkv_proj_kernel(%arg0: i32, %arg1: i32, %arg2: memref<1x8x32xbf16, #tpu.memory_space<vmem>>, %arg3: memref<32x768xbf16, #tpu.memory_space<vmem>>, %arg4: memref<1x8x256xbf16, #tpu.memory_space<vmem>>, %arg5: memref<1x8x256xbf16, #tpu.memory_space<vmem>>, %arg6: memref<1x8x256xbf16, #tpu.memory_space<vmem>>) attributes {dimension_semantics = [#tpu.dimension_semantics<parallel>, #tpu.dimension_semantics<parallel>], iteration_bounds = array<i64: 2, 1>, scalar_prefetch = 0 : i64, scratch_operands = 0 : i64, tpu.core_type = #tpu.core_type<tc>, window_params = [{transform_indices = @transform_0, window_bounds = array<i64: 1, 8, 32>}, {pipeline_mode = #tpu.pipeline_mode<synchronous>, transform_indices = @transform_1, window_bounds = array<i64: 32, 768>}, {transform_indices = @transform_2, window_bounds = array<i64: 1, 8, 256>}, {transform_indices = @transform_3, window_bounds = array<i64: 1, 8, 256>}, {transform_indices = @transform_4, window_bounds = array<i64: 1, 8, 256>}]} {
    %c0 = arith.constant 0 : index
    %c0_0 = arith.constant 0 : index
    %c0_1 = arith.constant 0 : index
    %0 = vector.load %arg2[%c0, %c0_0, %c0_1] : memref<1x8x32xbf16, #tpu.memory_space<vmem>>, vector<1x8x32xbf16>
    %1 = vector.shape_cast %0 : vector<1x8x32xbf16> to vector<8x32xbf16>
    %c0_2 = arith.constant 0 : index
    %c0_3 = arith.constant 0 : index
    %2 = vector.load %arg3[%c0_2, %c0_3] : memref<32x768xbf16, #tpu.memory_space<vmem>>, vector<32x768xbf16>
    %cst = arith.constant dense<0.000000e+00> : vector<8x768xf32>
    %3 = tpu.matmul %1, %2, %cst {dimension_numbers = #tpu.dot_dimension_numbers<[1], [0], [0], [1], [0, 0, 1, 1], [], []>} : vector<8x32xbf16>, vector<32x768xbf16>, vector<8x768xf32> -> vector<8x768xf32>
    %4 = arith.truncf %3 : vector<8x768xf32> to vector<8x768xbf16>
    %5 = vector.extract_strided_slice %4 {offsets = [0, 0], sizes = [8, 256], strides = [1, 1]} : vector<8x768xbf16> to vector<8x256xbf16>
    %c0_4 = arith.constant 0 : index
    %c0_5 = arith.constant 0 : index
    %c0_6 = arith.constant 0 : index
    %6 = vector.load %arg4[%c0_4, %c0_5, %c0_6] : memref<1x8x256xbf16, #tpu.memory_space<vmem>>, vector<1x8x256xbf16>
    %7 = vector.shape_cast %6 : vector<1x8x256xbf16> to vector<8x256xbf16>
    %8 = vector.shape_cast %5 : vector<8x256xbf16> to vector<1x8x256xbf16>
    tpu.vector_store %arg4[%c0_4, %c0_5, %c0_6], %8 {strides = array<i32>} : memref<1x8x256xbf16, #tpu.memory_space<vmem>>, vector<1x8x256xbf16>,
    %9 = vector.extract_strided_slice %4 {offsets = [0, 256], sizes = [8, 256], strides = [1, 1]} : vector<8x768xbf16> to vector<8x256xbf16>
    %c0_7 = arith.constant 0 : index
    %c0_8 = arith.constant 0 : index
    %c0_9 = arith.constant 0 : index
    %10 = vector.load %arg5[%c0_7, %c0_8, %c0_9] : memref<1x8x256xbf16, #tpu.memory_space<vmem>>, vector<1x8x256xbf16>
    %11 = vector.shape_cast %10 : vector<1x8x256xbf16> to vector<8x256xbf16>
    %12 = vector.shape_cast %9 : vector<8x256xbf16> to vector<1x8x256xbf16>
    tpu.vector_store %arg5[%c0_7, %c0_8, %c0_9], %12 {strides = array<i32>} : memref<1x8x256xbf16, #tpu.memory_space<vmem>>, vector<1x8x256xbf16>,
    %13 = vector.extract_strided_slice %4 {offsets = [0, 512], sizes = [8, 256], strides = [1, 1]} : vector<8x768xbf16> to vector<8x256xbf16>
    %c0_10 = arith.constant 0 : index
    %c0_11 = arith.constant 0 : index
    %c0_12 = arith.constant 0 : index
    %14 = vector.load %arg6[%c0_10, %c0_11, %c0_12] : memref<1x8x256xbf16, #tpu.memory_space<vmem>>, vector<1x8x256xbf16>
    %15 = vector.shape_cast %14 : vector<1x8x256xbf16> to vector<8x256xbf16>
    %16 = vector.shape_cast %13 : vector<8x256xbf16> to vector<1x8x256xbf16>
    tpu.vector_store %arg6[%c0_10, %c0_11, %c0_12], %16 {strides = array<i32>} : memref<1x8x256xbf16, #tpu.memory_space<vmem>>, vector<1x8x256xbf16>,
    return
  }
  func.func @transform_0(%arg0: i32, %arg1: i32) -> (i32, i32, i32) {
    %c0_i32 = arith.constant 0 : i32
    %c0_i32_0 = arith.constant 0 : i32
    return %arg0, %arg1, %c0_i32 : i32, i32, i32
  }
  func.func @transform_1(%arg0: i32, %arg1: i32) -> (i32, i32) {
    %c0_i32 = arith.constant 0 : i32
    %c0_i32_0 = arith.constant 0 : i32
    %c0_i32_1 = arith.constant 0 : i32
    return %c0_i32, %c0_i32_0 : i32, i32
  }
  func.func @transform_2(%arg0: i32, %arg1: i32) -> (i32, i32, i32) {
    %c0_i32 = arith.constant 0 : i32
    %c0_i32_0 = arith.constant 0 : i32
    return %arg0, %arg1, %c0_i32 : i32, i32, i32
  }
  func.func @transform_3(%arg0: i32, %arg1: i32) -> (i32, i32, i32) {
    %c0_i32 = arith.constant 0 : i32
    %c0_i32_0 = arith.constant 0 : i32
    return %arg0, %arg1, %c0_i32 : i32, i32, i32
  }
  func.func @transform_4(%arg0: i32, %arg1: i32) -> (i32, i32, i32) {
    %c0_i32 = arith.constant 0 : i32
    %c0_i32_0 = arith.constant 0 : i32
    return %arg0, %arg1, %c0_i32 : i32, i32, i32
  }
}

</mosaic_0001>

<bundles_post_ra>
// kernel: tpu_custom_call.1
= control target key start
LH: loop header
LB: loop body
LE: loop exit
PB: predicated region body
PF: predicated region fallthrough
CT: control target
= control target key end

     0   :  { %s1350_s0 = inlined_call_operand.hbm [shape: bf16[2,8,32], index: 0, kind: input, shape index: {}]   ;;  %s1351_s1 = inlined_call_operand.hbm [shape: bf16[32,768], index: 1, kind: input, shape index: {}]   ;;  %s1352_s2 = inlined_call_operand.hbm [shape: bf16[2,8,256], index: 2, kind: output, shape index: {0}]   ;;  %s1353_s3 = inlined_call_operand.hbm [shape: bf16[2,8,256], index: 3, kind: output, shape index: {1}]   ;;  %s1354_s4 = inlined_call_operand.hbm [shape: bf16[2,8,256], index: 4, kind: output, shape index: {2}]  }
   0x1   :  { %1357 = sst [smem:[#allocation15_spill]] %s1351_s1 }
   0x2   :  { %10 = vsyncpa [#allocation3], 0 }
   0x3   :  { %12 = vsyncpa [#allocation3 + $0x1], 0 }
   0x4   :  { %13 = vsyncpa [#allocation6], 0 }
   0x5   :  { %14 = vsyncpa [#allocation4], 0 }
   0x6   :  { %16 = vsyncpa [#allocation4 + $0x1], 0 }
   0x7   :  { %17 = vsyncpa [#allocation9], 0 }
   0x8   :  { %19 = vsyncpa [#allocation9 + $0x1], 0  ;;  %s1094_s15 = smov 0   ;;  %s1096_s16 = smov 0  }
   0x9   :  { %s1098_s17 = smov 0   ;;  %s1100_s18 = smov 0  }
   0xa   :  { %s1102_s19 = smov 0   ;;  %s1104_s20 = smov 0  }
   0xb LB: > { %s1125_s21 = sadd.s32 4294967295, %s1059_s20   ;;  %s1355_s22 = sadd.s32 4294967294, %s1059_s20   ;;  %s1059_s20 = sphi %s1104_s20, %s25_s20   ;;  %s1055_s19 = sphi %s1102_s19, %s1377_s19   ;;  %s1051_s18 = sphi %s1100_s18, %s1376_s18   ;;  %s1047_s17 = sphi %s1098_s17, %s1375_s17   ;;  %s1043_s16 = sphi %s1096_s16, %s1374_s16   ;;  %s1039_s15 = sphi %s1094_s15, %s1373_s15  }
   0xc   : > { %p59_p0 = scmp.ne.s32.totalorder %s1043_s16, %s1039_s15  ;;  %p1356_p1 = scmp.eq.s32.totalorder %s1125_s21, 0 }
   0xd   : > { %p112_p3 = scmp.eq.s32.totalorder %s1355_s22, 1  ;;  %p715_p5 = scmp.ge.s32.totalorder %s1059_s20, 1 }
   0xe   : > { %p1136_p4 = por %p1356_p1, %p59_p0  ;;  %p175_p7 = scmp.lt.s32.totalorder %s1059_s20, 3 }
   0xf   : > { %p1141_p6 = por %p112_p3, %p59_p0  ;;  %s1061_s26 = smov [#allocation5]  }
  0x10   : > { %p1146_p8 = pnand %p715_p5, %p175_p7  ;;  %s187_s27 = sshll.u32 %s1061_s26, 4  ;;  %s188_s27 = int_to_ptr.vmem [resolvable:$true] %s187_s27 }
  0x11   : > { %s1359_s24 = scalar_select %p1141_p6, 1, 0 }
  0x12   : > { %p773_p9 = pneg %p1146_p8  ;;  %s37_s29 = sadd.s32 1, %s1055_s19 }
  0x13   : > { %s876_s30 = scalar_lea.vmem %s188_s27, 1536  ;;  %p884_p5 = scmp.lt.s32.totalorder %s188_s27, %s188_s27 }
  0x14   : > { %p1155_p11 = pnand %p773_p9, %p1356_p1  ;;  %p877_p13 = scmp.ne.s32.totalorder %s188_s27, %s876_s30 }
  0x15   : > { %p885_p7 = scmp.lt.s32.totalorder %s876_s30, %s876_s30 }
  0x16   : > { %p867_p12 = pneg %p1155_p11 }
  0x17   : > { %p886_p2 = por %p885_p7, %p884_p5 }
  0x18   : > { %p879_p0 = pnand %p877_p13, %p867_p12 }
  0x1a   : > { %p880_p3 = pneg %p879_p0 }
  0x1c   : > { %p887_p6 = pnand %p886_p2, %p880_p3 }
  0x1e   : > { %890 = shalt.err (!%p887_p6)
}
  0x1f   : > { %s1062_s5 = smov 384   ;;  %s1063_s6 = smov 24  }
  0x20   : > { %s1362_s1 = sld [smem:[#allocation15_spill]]  ;;  %p39_p2 = scmp.ge.s32.totalorder %s37_s29, 2 }
  0x21   : > { %s46_s9 = sadd.s32 1, %s1047_s17  ;;  %p53_p6 = scmp.ne.s32.totalorder %s1047_s17, %s1043_s16 }
  0x22   : > { %p54_p9 = scmp.eq.s32.totalorder %s1059_s20, 0  ;;  %s1379_s29 = smov (%p39_p2, %s37_s29), 0 }
  0x23   : > { %p1364_p13 = scmp.eq.s32.totalorder %s1125_s21, 1  ;;  %s41_s12 = ssub.s32 %s1055_s19, %s1379_s29 }
  0x24   : > { %p1173_p12 = por %p54_p9, %p53_p6  ;;  %p792_p3 = scmp.lt.s32.totalorder %s1059_s20, 2 }
  0x25   : > { %p1179_p0 = por %p1364_p13, %p53_p6  ;;  %s201_s13 = sand.u32 1, %s1047_s17  }
  0x26   : > { %776 = dma.hbm_to_vmem [thread:$0]  (!%p1155_p11), %s1362_s1, 1536, %s188_s27, [#allocation6], %s1062_s5, %s1062_s5, %s1063_s6  }
  0x27   : > { %p44_p11 = scmp.eq.s32.totalorder %s41_s12, 0  ;;  %s718_s14 = sshll.u32 %s201_s13, 2 }
  0x28   : > { %s719_s27 = sshll.u32 %s1055_s19, 6  ;;  %s205_s6 = scalar_lea.vmem [#allocation2], %s718_s14 }
  0x29   : > { %s1188_s26 = scalar_select %p44_p11, %s1047_s17, %s46_s9  }
  0x2a   : > { %s211_s5 = scalar_lea.hbm %s1350_s0, %s719_s27  ;;  %s213_s7 = sshll.u32 %s205_s6, 4  ;;  %s214_s7 = int_to_ptr.vmem [resolvable:$true] %s213_s7 }
  0x2b   : > { %p1196_p5 = pnand %p792_p3, %p1173_p12  ;;  %s202_s22 = scalar_lea.sflag [#allocation3], %s201_s13 }
  0x2c   : > { %s904_s12 = scalar_lea.vmem %s214_s7, 64  ;;  %s1064_s9 = smov [#allocation2]  }
  0x2d   : > { %p893_p7 = pneg %p1196_p5  ;;  %p905_p2 = scmp.ne.s32.totalorder %s214_s7, %s904_s12 }
  0x2e   : > { %s909_s1 = sshll.u32 %s1064_s9, 4  ;;  %s910_s1 = int_to_ptr.vmem [resolvable:$false] %s909_s1 }
  0x2f   : > { %p907_p6 = pnand %p905_p2, %p893_p7  ;;  %s911_s27 = scalar_lea.vmem %s910_s1, 128 }
  0x30   : > { %p912_p13 = scmp.lt.s32.totalorder %s214_s7, %s910_s1  ;;  %p913_p11 = scmp.lt.s32.totalorder %s911_s27, %s904_s12 }
  0x31   : > { %p908_p9 = pneg %p907_p6 }
  0x32   : > { %p914_p10 = por %p913_p11, %p912_p13 }
  0x34   : > { %p915_p1 = pnand %p914_p10, %p908_p9 }
  0x36   : > { %918 = shalt.err (!%p915_p1)
}
  0x37   : > { %780 = dma.hbm_to_vmem [thread:$0]  (!%p1196_p5), %s211_s5, 64, %s214_s7, %s202_s22  }
  0x38   : > { %222 = sbr.rel (%p1146_p8) target bundleno = 336 (0x150), region = 28  ;;  %s1207_s10 = sand.u32 (!%p1146_p8), 1, %s1043_s16  }
  0x39   : > { %s721_s13 = sshll.u32 (!%p1146_p8), %s1207_s10, 2  ;;  %s225_s14 = scalar_lea.sflag (!%p1146_p8), [#allocation3], %s1207_s10 }
  0x3a   : > { %s228_s28 = scalar_lea.vmem (!%p1146_p8), [#allocation2], %s721_s13 }
  0x3d   : > { %1022 = dma.done.wait (%p1136_p4), %s225_s14, 64  }
  0x3e   : > { %1024 = vsyncadd (%p1136_p4), %s225_s14, 4294967232  ;;  %p1367_p1 = scmp.eq.s32.totalorder %s1125_s21, 0 }
  0x40   : > { %1026 = dma.done.wait (%p1367_p1), [#allocation6], 1536   ;;  %p1368_p10 = pmov %p1367_p1 }
  0x41   : > { %v1065_v0 = vmov 0   ;;  %v847_v1 = vld [vmem:[#allocation5 + $0x34] ss:$24 sps:$4 sm:$0xff]   ;;  %v849_v2 = vld [vmem:[#allocation5 + $0x30] ss:$24 sps:$4 sm:$0xff]   ;;  %vm341_vm0 = vcmask 261120  }
  0x42   : > { %1028 = vsyncadd (%p1368_p10), [#allocation6], 4294965760  ;;  %377 = vmatprep.mubr.bf16.mxu0 %v1065_v0  ;;  %418 = vmatprep.mubr.bf16.mxu1 %v1065_v0  ;;  %v850_v3 = vld [vmem:[#allocation5 + $0x3c] ss:$24 sps:$4 sm:$0xff]   ;;  %v852_v4 = vld [vmem:[#allocation5 + $0x38] ss:$24 sps:$4 sm:$0xff]  }
  0x43   : > { %357 = vmatprep.subr.bf16.mxu0 %v847_v1  ;;  %v853_v5 = vld [vmem:[#allocation5 + $0x4] ss:$24 sps:$4 sm:$0xff]   ;;  %v855_v6 = vld [vmem:[#allocation5] ss:$24 sps:$4 sm:$0xff]   ;;  %398 = vmatprep.subr.bf16.mxu1 %v850_v3  ;;  %v864_v12 = vld [vmem:[#allocation5 + $0x14] ss:$24 sps:$4 sm:$0xff]  }
  0x44   : > { %358 = vmatpush1.bf16.msra.mxu0 %v849_v2  ;;  %v856_v7 = vld [vmem:[#allocation5 + $0xc] ss:$24 sps:$4 sm:$0xff]   ;;  %399 = vmatpush1.bf16.msra.mxu1 %v852_v4  ;;  %v858_v8 = vld [vmem:[#allocation5 + $0x8] ss:$24 sps:$4 sm:$0xff]   ;;  %v268_v9 = vld [vmem:[%s228_s28] sm:$0xf] }
  0x45   : > { %359 = vmatprep.subr.bf16.mxu0 %v853_v5  ;;  %400 = vmatprep.subr.bf16.mxu1 %v856_v7  ;;  %v861_v10 = vld [vmem:[#allocation5 + $0x44] ss:$24 sps:$4 sm:$0xff]   ;;  %v859_v11 = vld [vmem:[#allocation5 + $0x40] ss:$24 sps:$4 sm:$0xff]   ;;  %v862_v13 = vld [vmem:[#allocation5 + $0x10] ss:$24 sps:$4 sm:$0xff]  }
  0x46   : > { %s1220_s1 = sshll.u32 %s1207_s10, 3  ;;  %s1223_s22 = sshll.u32 %s1051_s18, 7 }
  0x47   : > { %s252_s23 = scalar_lea.vmem [#allocation7], %s1220_s1  ;;  %s259_s5 = scalar_lea.vmem [#allocation8], %s1220_s1 }
  0x48   : > { %360 = vmatpush1.bf16.msra.mxu0 %v855_v6  ;;  %401 = vmatpush1.bf16.msra.mxu1 %v858_v8  ;;  %s522_s25 = sshll.u32 %s252_s23, 4  ;;  %s538_s6 = sshll.u32 %s259_s5, 4  ;;  %s1236_s25 = int_to_ptr.vmem [resolvable:$true] %s522_s25  ;;  %s1244_s6 = int_to_ptr.vmem [resolvable:$true] %s538_s6 }
  0x49   : > { %439 = vmatprep.subr.bf16.mxu0 %v861_v10  ;;  %s1234_s12 = scalar_lea.hbm %s1352_s2, %s1223_s22  ;;  %s1242_s27 = scalar_lea.hbm %s1353_s3, %s1223_s22 }
  0x4a   : > { %s496_s13 = scalar_lea.sflag [#allocation4], %s1207_s10  ;;  %s919_s14 = scalar_lea.vmem %s1236_s25, 128 }
  0x4b   : > { %738 = vmatmul.mubr.msk.bf16.vlgmr.msra.gmra.mxu0 %vm341_vm0, %v268_v9  ;;  %739 = vmatmul.mubr.msk.bf16.vlgmr.msra.gmra.mxu1 %vm341_vm0, %v268_v9  ;;  %p920_p4 = scmp.ne.s32.totalorder %s1236_s25, %s919_s14  ;;  %s1066_s28 = smov [#allocation7]  }
  0x4c   : > { %440 = vmatpush1.bf16.msra.mxu0 %v859_v11  ;;  %459 = vmatprep.mubr.bf16.mxu0 %v1065_v0  ;;  %s923_s7 = sshll.u32 %s1066_s28, 4  ;;  %s924_s7 = int_to_ptr.vmem [resolvable:$false] %s923_s7 }
  0x4d   : > { %441 = vmatprep.subr.bf16.mxu0 %v864_v12  ;;  %p921_p8 = pnand %p920_p4, %p1179_p0  ;;  %p926_p3 = scmp.lt.s32.totalorder %s1236_s25, %s924_s7 }
  0x4f   : > { %p922_p12 = pneg %p921_p8 }
  0x50   : > { %442 = vmatpush1.bf16.msra.mxu0 %v862_v13 }
  0x53   : > { %740 = vmatmul.mubr.msk.bf16.vlgmr.msra.gmra.mxu0 %vm341_vm0, %v268_v9 }
 0x10b   : > { %v379_v14 = vpop.f32.mrf.mxu0  ;;  %v420_v16 = vpop.f32.mrf.mxu1 }
 0x10d   : > { %v381_v15 = vpop.f32.mrf.mxu0  ;;  %v422_v19 = vpop.f32.mrf.mxu1 }
 0x10e   : > { %v755_v17 = vpack.c.bf16 %v381_v15, %v379_v14  ;;  %v756_v20 = vpack.c.bf16 %v422_v19, %v420_v16 }
 0x10f   : > { %v383_v18 = vpop.f32.mrf.mxu0  ;;  %v424_v22 = vpop.f32.mrf.mxu1 }
 0x110   : > { %480 = vst [vmem:[%s252_s23] sm:$0xff] %v755_v17  ;;  %s925_s23 = scalar_lea.vmem %s924_s7, 256 }
 0x111   : > { %v384_v21 = vpop.f32.mrf.mxu0  ;;  %p927_p5 = scmp.lt.s32.totalorder %s925_s23, %s919_s14 }
 0x113   : > { %p928_p7 = por %p927_p5, %p926_p3 }
 0x115   : > { %p929_p2 = pnand %p928_p7, %p922_p12 }
 0x117   : > { %932 = shalt.err (!%p929_p2)
}
 0x118   : > { %s933_s8 = scalar_lea.hbm %s1234_s12, 128  ;;  %s937_s9 = scalar_lea.hbm %s1352_s2, 256 }
 0x119   : > { %p934_p6 = scmp.ne.s32.totalorder %s1234_s12, %s933_s8  ;;  %p938_p11 = scmp.lt.s32.totalorder %s1234_s12, %s1352_s2 }
 0x11a   : > { %p939_p1 = scmp.lt.s32.totalorder %s937_s9, %s933_s8 }
 0x11b   : > { %p935_p9 = pnand %p934_p6, %p1179_p0 }
 0x11c   : > { %p940_p10 = por %p939_p1, %p938_p11 }
 0x11d   : > { %p936_p13 = pneg %p935_p9 }
 0x11f   : > { %p941_p4 = pnand %p940_p10, %p936_p13 }
 0x121   : > { %944 = shalt.err (!%p941_p4)
}
 0x122   : > { %767 = dma.vmem_to_hbm [thread:$0]  (%p1179_p0), %s1236_s25, 128, %s1234_s12, %s496_s13   ;;  %487 = vst [vmem:[%s259_s5] sm:$0xff] %v756_v20  ;;  %v425_v23 = vpop.f32.mrf.mxu1  ;;  %v461_v24 = vpop.f32.mrf.mxu0 }
 0x123   : > { %s266_s30 = scalar_lea.vmem [#allocation10], %s1220_s1  ;;  %s1369_s7 = sand.u32 1, %s1125_s21  }
 0x124   : > { %s1272_s14 = sshll.u32 %s266_s30, 4  ;;  %s1276_s23 = scalar_lea.sflag [#allocation9], %s1369_s7  ;;  %s555_s14 = int_to_ptr.vmem [resolvable:$true] %s1272_s14 }
 0x125   : > { %s945_s8 = scalar_lea.vmem %s1244_s6, 128  ;;  %s1067_s10 = smov [#allocation8]  }
 0x126   : > { %p946_p8 = scmp.ne.s32.totalorder %s1244_s6, %s945_s8  ;;  %s949_s18 = sshll.u32 %s1067_s10, 4  ;;  %s950_s18 = int_to_ptr.vmem [resolvable:$false] %s949_s18 }
 0x127   : > { %s951_s25 = scalar_lea.vmem %s950_s18, 256  ;;  %p952_p5 = scmp.lt.s32.totalorder %s1244_s6, %s950_s18 }
 0x128   : > { %p947_p12 = pnand %p946_p8, %p1179_p0  ;;  %p953_p7 = scmp.lt.s32.totalorder %s951_s25, %s945_s8 }
 0x12a   : > { %p948_p3 = pneg %p947_p12  ;;  %p954_p2 = por %p953_p7, %p952_p5 }
 0x12c   : > { %p955_p6 = pnand %p954_p2, %p948_p3 }
 0x12e   : > { %958 = shalt.err (!%p955_p6)
}
 0x12f   : > { %s959_s21 = scalar_lea.hbm %s1242_s27, 128  ;;  %s963_s13 = scalar_lea.hbm %s1353_s3, 256 }
 0x130   : > { %p960_p9 = scmp.ne.s32.totalorder %s1242_s27, %s959_s21  ;;  %p964_p1 = scmp.lt.s32.totalorder %s1242_s27, %s1353_s3 }
 0x131   : > { %p965_p10 = scmp.lt.s32.totalorder %s963_s13, %s959_s21 }
 0x132   : > { %p961_p13 = pnand %p960_p9, %p1179_p0 }
 0x133   : > { %p966_p4 = por %p965_p10, %p964_p1 }
 0x134   : > { %p962_p11 = pneg %p961_p13 }
 0x136   : > { %p967_p8 = pnand %p966_p4, %p962_p11 }
 0x138   : > { %970 = shalt.err (!%p967_p8)
}
 0x139   : > { %768 = dma.vmem_to_hbm [thread:$0]  (%p1179_p0), %s1244_s6, 128, %s1242_s27, %s1276_s23   ;;  %v463_v25 = vpop.f32.mrf.mxu0 }
 0x13a   : > { %v757_v26 = vpack.c.bf16 %v463_v25, %v461_v24  ;;  %s1303_s10 = scalar_lea.hbm %s1354_s4, %s1223_s22  ;;  %s971_s18 = scalar_lea.vmem %s555_s14, 128 }
 0x13b   : > { %v465_v27 = vpop.f32.mrf.mxu0  ;;  %p972_p12 = scmp.ne.s32.totalorder %s555_s14, %s971_s18  ;;  %s1068_s25 = smov [#allocation10]  }
 0x13c   : > { %494 = vst [vmem:[%s266_s30] sm:$0xff] %v757_v26  ;;  %s975_s21 = sshll.u32 %s1068_s25, 4  ;;  %s976_s21 = int_to_ptr.vmem [resolvable:$false] %s975_s21 }
 0x13d   : > { %v466_v28 = vpop.f32.mrf.mxu0  ;;  %p973_p3 = pnand %p972_p12, %p1179_p0  ;;  %s977_s6 = scalar_lea.vmem %s976_s21, 256 }
 0x13e   : > { %p978_p7 = scmp.lt.s32.totalorder %s555_s14, %s976_s21  ;;  %p979_p2 = scmp.lt.s32.totalorder %s977_s6, %s971_s18 }
 0x13f   : > { %p974_p5 = pneg %p973_p3 }
 0x140   : > { %p980_p6 = por %p979_p2, %p978_p7 }
 0x142   : > { %p981_p9 = pnand %p980_p6, %p974_p5 }
 0x144   : > { %984 = shalt.err (!%p981_p9)
}
 0x145   : > { %s985_s1 = scalar_lea.hbm %s1303_s10, 128  ;;  %s989_s30 = scalar_lea.hbm %s1354_s4, 256 }
 0x146   : > { %p986_p13 = scmp.ne.s32.totalorder %s1303_s10, %s985_s1  ;;  %p990_p10 = scmp.lt.s32.totalorder %s1303_s10, %s1354_s4 }
 0x147   : > { %p991_p4 = scmp.lt.s32.totalorder %s989_s30, %s985_s1 }
 0x148   : > { %p987_p11 = pnand %p986_p13, %p1179_p0 }
 0x149   : > { %p992_p8 = por %p991_p4, %p990_p10 }
 0x14a   : > { %p988_p1 = pneg %p987_p11 }
 0x14c   : > { %p993_p12 = pnand %p992_p8, %p988_p1 }
 0x14e   : > { %996 = shalt.err (!%p993_p12)
}
 0x14f   : > { %769 = dma.vmem_to_hbm [thread:$0]  (%p1179_p0), %s555_s14, 128, %s1303_s10, %s1276_s23  }
 0x150 PF: > { %s566_s13 = sand.u32 1, %s1039_s15   ;;  %p1370_p3 = scmp.ne.s32.totalorder %s1359_s24, 0 }
 0x151   : > { %p1371_p5 = scmp.ge.s32.totalorder %s1059_s20, 2  ;;  %s567_s9 = scalar_lea.sflag [#allocation4], %s566_s13 }
 0x153   : > { %p782_p7 = pnand %p1371_p5, %p1370_p3 }
 0x155   : > { %p783_p2 = pneg %p782_p7 }
 0x157   : > { %1030 = dma.done.wait (%p783_p2), %s567_s9, 128  }
 0x158   : > { %1032 = vsyncadd (%p783_p2), %s567_s9, 4294967168  ;;  %s1372_s28 = sadd.s32 4294967294, %s1059_s20  }
 0x159   : > { %s575_s7 = sand.u32 1, %s1372_s28  }
 0x15a   : > { %s576_s8 = scalar_lea.sflag [#allocation9], %s575_s7 }
 0x15b   : > { %1034 = dma.done.wait (%p783_p2), %s576_s8, 256  }
 0x15c   : > { %1036 = vsyncadd (%p783_p2), %s576_s8, 4294967040  ;;  %s25_s20 = sadd.s32 1, %s1059_s20   ;;  %s1373_s15 = smov %s1043_s16 }
 0x15d   : > { %p22_p0 = scmp.ge.s32.totalorder %s25_s20, 4   ;;  %s1374_s16 = smov %s1047_s17 }
 0x15e   : > { %s1375_s17 = smov %s1188_s26  ;;  %s1376_s18 = smov %s1055_s19 }
 0x15f   : > { %s1377_s19 = smov %s1379_s29  ;;  %24 = sbr.rel (!%p22_p0) target bundleno = 11 (0xb), region = 109 }
 0x164   :  { %590 = vsyncpa [#allocation3], 1 }
 0x165   :  { %592 = vsyncpa [#allocation3 + $0x1], 1 }
 0x166   :  { %593 = vsyncpa [#allocation6], 1 }
 0x167   :  { %594 = vsyncpa [#allocation4], 1 }
 0x168   :  { %596 = vsyncpa [#allocation4 + $0x1], 1 }
 0x169   :  { %597 = vsyncpa [#allocation9], 1 }
 0x16a   :  { %599 = vsyncpa [#allocation9 + $0x1], 1 }

</bundles_post_ra>
